<compile_context>
chip_gen: v7x
topology: tpu7x:2x2x1
jax: 0.10.0
libtpu: 0.0.40
codegen_flags: <defaults>
</compile_context>

<pallas_src>
import functools

import jax
import jax.numpy as jnp
from jax.experimental import pallas as pl
from jax.experimental.pallas import tpu as pltpu


def _lrn_kernel(x_ref, o_ref, *, C, local_size, alpha, beta):
    """One (R, T) block; R = Nb*C rows (C channels per image, Nb images)."""
    x = x_ref[...]
    xf = x.astype(jnp.float32)
    x2 = xf * xf
    R, _ = x2.shape
    pad = (local_size - 1) // 2

    acc = x2
    if local_size > 1:
        row = jax.lax.broadcasted_iota(jnp.int32, (R, 1), 0)
        ch = row if R == C else row % C
        for off in range(-pad, local_size - pad):
            if off == 0 or abs(off) >= C:
                continue
            # shifted[r] = x2[(r + off) % R] via an XLU sublane roll; rows whose
            # window would cross an image boundary are zeroed by the mask.
            shifted = pltpu.roll(x2, shift=(-off) % R, axis=0)
            mask = ch < (C - off) if off > 0 else ch >= (-off)
            acc = acc + jnp.where(mask, shifted, 0.0)

    # AvgPool3d divides by local_size (count_include_pad=True default).
    base = acc * (alpha / local_size) + 1.0

    if beta == 0.75:
        # base^(-0.75) = rsqrt(base^1.5): sqrt + rsqrt on the EUP, one VPU mul.
        inv = jax.lax.rsqrt(base * jnp.sqrt(base))
    else:
        # Generic exponent: base >= 1 always, so log is safe.
        inv = jnp.exp(jnp.log(base) * (-beta))

    o_ref[...] = (xf * inv).astype(o_ref.dtype)


def _round_up(v, m):
    return (v + m - 1) // m * m


def _vmem_budget_and_limit():
    """(per-block working-set budget, vmem_limit_bytes).

    Conservative default fits v7x (64 MiB physical / 32 MiB scoped VMEM);
    raised on 128 MiB parts (v5e / v6e).
    """
    budget, limit = 16 * 1024 * 1024, 32 * 1024 * 1024
    try:
        cap = getattr(pltpu.get_tpu_info(), "vmem_capacity_bytes", None)
        if cap is not None and int(cap) >= 96 * 1024 * 1024:
            budget, limit = 32 * 1024 * 1024, 64 * 1024 * 1024
    except Exception:
        pass
    return budget, limit


def _choose_tiling(N, C, HW, itemsize, budget):
    """Pick (nb, tile_hw, hw_pad, grid) for blocks of shape (nb*C, tile_hw).

    Block bytes ~ nb*C*tile*(2*in + 2*out double-buffered + ~5 f32 temps) stays
    inside `budget`.  HW is padded up to tile * n_j built from near-equal
    128-multiple chunks (never collapses the tile to 128 for awkward HW), and
    the grid is re-split when it would have a single step so both v7x
    TensorCores get work.
    """
    bytes_per_elem = 4 * itemsize + 5 * 4
    max_elems = max(budget // bytes_per_elem, C * 128)
    max_lanes = max(128, (max_elems // C) // 128 * 128)

    hw_pad0 = _round_up(HW, 128)
    n_j = -(-hw_pad0 // max_lanes)                 # number of lane blocks
    tile = _round_up(-(-hw_pad0 // n_j), 128)      # near-equal 128-mult chunks
    hw_pad = tile * n_j

    # Images per block (>1 only when one image's lanes fit a single block).
    nb_afford = max(1, max_lanes // tile) if n_j == 1 else 1
    divisors = [d for d in range(1, N + 1) if N % d == 0 and d <= nb_afford]
    nb = max(divisors) if divisors else 1

    # Megacore awareness: prefer >= 2 grid steps along a "parallel" axis.
    if n_j * (N // nb) < 2:
        smaller = [d for d in divisors if N // d >= 2]
        if smaller:
            nb = max(smaller)
        elif tile >= 256:
            n_j = 2
            tile = _round_up(-(-hw_pad0 // 2), 128)
            hw_pad = tile * 2

    return nb, tile, hw_pad, (N // nb, n_j)


def lrn_pallas(x, local_size=1, alpha=1.0, beta=0.75):
    """x: (N, C, H, W). Returns same shape/dtype. ACROSS_CHANNELS=True LRN."""
    N, C, H, W = x.shape
    HW = H * W
    # Zero-padded channels contribute 0 to the windowed sum, so padding C up to
    # a sublane multiple keeps a single roll-based code path for any C.
    C_pad = _round_up(C, 8)
    budget, vmem_limit = _vmem_budget_and_limit()
    nb, tile, hw_pad, grid = _choose_tiling(N, C_pad, HW, x.dtype.itemsize, budget)

    x_flat = x.reshape(N, C, HW)
    if C_pad != C or hw_pad != HW:
        x_flat = jnp.pad(x_flat, ((0, 0), (0, C_pad - C), (0, hw_pad - HW)))
    x2d = x_flat.reshape(N * C_pad, hw_pad)

    R = nb * C_pad
    kernel = functools.partial(
        _lrn_kernel, C=C_pad, local_size=local_size, alpha=alpha, beta=beta
    )
    out2d = pl.pallas_call(
        kernel,
        out_shape=jax.ShapeDtypeStruct((N * C_pad, hw_pad), x.dtype),
        grid_spec=pltpu.PrefetchScalarGridSpec(
            num_scalar_prefetch=0,
            grid=grid,
            in_specs=[pl.BlockSpec((R, tile), lambda i, j: (i, j))],
            out_specs=pl.BlockSpec((R, tile), lambda i, j: (i, j)),
        ),
        compiler_params=pltpu.CompilerParams(
            dimension_semantics=("parallel", "parallel"),
            vmem_limit_bytes=vmem_limit,
        ),
    )(x2d)

    out = out2d.reshape(N, C_pad, hw_pad)
    if C_pad != C or hw_pad != HW:
        out = out[:, :C, :HW]
    return out.reshape(N, C, H, W)


def lrn_reference(x, local_size=1, alpha=1.0, beta=0.75):
    """Pure-JAX reference matching the PyTorch module (ACROSS_CHANNELS=True)."""
    N, C, H, W = x.shape
    pad = (local_size - 1) // 2
    x2 = x * x
    x2p = jnp.pad(x2, ((0, 0), (pad, pad), (0, 0), (0, 0)))
    acc = jnp.zeros_like(x2)
    for k in range(local_size):
        acc = acc + x2p[:, k : k + C, :, :]
    avg = acc / local_size  # count_include_pad=True
    div = jnp.power(avg * alpha + 1.0, beta)
    return x / div


if __name__ == "__main__":
    key = jax.random.PRNGKey(0)
    k1, k2, k3, k4, k5 = jax.random.split(key, 5)

    def _run(k, shape, local_size, alpha, beta, tol):
        x = jax.random.normal(k, shape, dtype=jnp.float32)
        out = jax.block_until_ready(
            lrn_pallas(x, local_size=local_size, alpha=alpha, beta=beta)
        )
        ref = lrn_reference(x, local_size=local_size, alpha=alpha, beta=beta)
        assert out.shape == x.shape and out.dtype == x.dtype
        assert jnp.allclose(out, ref, atol=tol, rtol=tol), (
            "mismatch",
            shape,
            local_size,
            alpha,
            float(jnp.max(jnp.abs(out - ref))),
        )

    # AlexNet-style hyperparameters (local_size=5, alpha=1e-4, beta=0.75).
    _run(k1, (2, 8, 16, 16), 5, 1e-4, 0.75, 1e-5)    # small C, clean HW
    _run(k2, (1, 128, 8, 16), 5, 1e-4, 0.75, 1e-5)   # large C
    _run(k3, (2, 8, 5, 5), 5, 1e-4, 0.75, 1e-5)      # ragged HW (lane padding)
    _run(k4, (2, 6, 13, 13), 5, 1e-4, 0.75, 1e-5)    # ragged C (channel padding)
    # Module defaults: local_size=1, alpha=1.0, beta=0.75.
    _run(k5, (2, 4, 16, 16), 1, 1.0, 0.75, 1e-4)

    print("KERNEL_OK")
</pallas_src>

<mosaic_0001>
module attributes {stable_mosaic.version = 11 : i64} {
  func.func @_lrn_kernel(%arg0: i32, %arg1: i32, %arg2: memref<8x256xf32, #tpu.memory_space<vmem>>, %arg3: memref<8x256xf32, #tpu.memory_space<vmem>>) attributes {dimension_semantics = [#tpu.dimension_semantics<parallel>, #tpu.dimension_semantics<parallel>], iteration_bounds = array<i64: 2, 1>, scalar_prefetch = 0 : i64, scratch_operands = 0 : i64, tpu.core_type = #tpu.core_type<tc>, window_params = [{transform_indices = @transform_0, window_bounds = array<i64: 8, 256>}, {transform_indices = @transform_1, window_bounds = array<i64: 8, 256>}]} {
    %c0 = arith.constant 0 : index
    %c0_0 = arith.constant 0 : index
    %0 = vector.load %arg2[%c0, %c0_0] : memref<8x256xf32, #tpu.memory_space<vmem>>, vector<8x256xf32>
    %1 = arith.mulf %0, %0 : vector<8x256xf32>
    %2 = tpu.iota {dimensions = array<i32: 0>} : vector<8x1xi32>
    %c2_i32 = arith.constant 2 : i32
    %3 = tpu.dynamic_rotate %1 by %c2_i32 dim 0 : vector<8x256xf32>, i32 -> vector<8x256xf32>
    %c2_i32_1 = arith.constant 2 : i32
    %4 = vector.broadcast %c2_i32_1 : i32 to vector<8x1xi32>
    %5 = arith.cmpi sge, %2, %4 : vector<8x1xi32>
    %cst = arith.constant 0.000000e+00 : f32
    %6 = vector.shape_cast %5 : vector<8x1xi1> to vector<8x1xi1>
    %7 = vector.broadcast %6 : vector<8x1xi1> to vector<8x256xi1>
    %8 = vector.broadcast %cst : f32 to vector<8x256xf32>
    %9 = arith.select %7, %3, %8 : vector<8x256xi1>, vector<8x256xf32>
    %10 = arith.addf %1, %9 : vector<8x256xf32>
    %c1_i32 = arith.constant 1 : i32
    %11 = tpu.dynamic_rotate %1 by %c1_i32 dim 0 : vector<8x256xf32>, i32 -> vector<8x256xf32>
    %c1_i32_2 = arith.constant 1 : i32
    %12 = vector.broadcast %c1_i32_2 : i32 to vector<8x1xi32>
    %13 = arith.cmpi sge, %2, %12 : vector<8x1xi32>
    %cst_3 = arith.constant 0.000000e+00 : f32
    %14 = vector.shape_cast %13 : vector<8x1xi1> to vector<8x1xi1>
    %15 = vector.broadcast %14 : vector<8x1xi1> to vector<8x256xi1>
    %16 = vector.broadcast %cst_3 : f32 to vector<8x256xf32>
    %17 = arith.select %15, %11, %16 : vector<8x256xi1>, vector<8x256xf32>
    %18 = arith.addf %10, %17 : vector<8x256xf32>
    %c7_i32 = arith.constant 7 : i32
    %19 = tpu.dynamic_rotate %1 by %c7_i32 dim 0 : vector<8x256xf32>, i32 -> vector<8x256xf32>
    %c7_i32_4 = arith.constant 7 : i32
    %20 = vector.broadcast %c7_i32_4 : i32 to vector<8x1xi32>
    %21 = arith.cmpi slt, %2, %20 : vector<8x1xi32>
    %cst_5 = arith.constant 0.000000e+00 : f32
    %22 = vector.shape_cast %21 : vector<8x1xi1> to vector<8x1xi1>
    %23 = vector.broadcast %22 : vector<8x1xi1> to vector<8x256xi1>
    %24 = vector.broadcast %cst_5 : f32 to vector<8x256xf32>
    %25 = arith.select %23, %19, %24 : vector<8x256xi1>, vector<8x256xf32>
    %26 = arith.addf %18, %25 : vector<8x256xf32>
    %c6_i32 = arith.constant 6 : i32
    %27 = tpu.dynamic_rotate %1 by %c6_i32 dim 0 : vector<8x256xf32>, i32 -> vector<8x256xf32>
    %c6_i32_6 = arith.constant 6 : i32
    %28 = vector.broadcast %c6_i32_6 : i32 to vector<8x1xi32>
    %29 = arith.cmpi slt, %2, %28 : vector<8x1xi32>
    %cst_7 = arith.constant 0.000000e+00 : f32
    %30 = vector.shape_cast %29 : vector<8x1xi1> to vector<8x1xi1>
    %31 = vector.broadcast %30 : vector<8x1xi1> to vector<8x256xi1>
    %32 = vector.broadcast %cst_7 : f32 to vector<8x256xf32>
    %33 = arith.select %31, %27, %32 : vector<8x256xi1>, vector<8x256xf32>
    %34 = arith.addf %26, %33 : vector<8x256xf32>
    %cst_8 = arith.constant 2.000000e-05 : f32
    %35 = vector.broadcast %cst_8 : f32 to vector<8x256xf32>
    %36 = arith.mulf %34, %35 : vector<8x256xf32>
    %cst_9 = arith.constant 1.000000e+00 : f32
    %37 = vector.broadcast %cst_9 : f32 to vector<8x256xf32>
    %38 = arith.addf %36, %37 : vector<8x256xf32>
    %39 = math.sqrt %38 : vector<8x256xf32>
    %40 = arith.mulf %38, %39 : vector<8x256xf32>
    %41 = math.rsqrt %40 : vector<8x256xf32>
    %42 = arith.mulf %0, %41 : vector<8x256xf32>
    %c0_10 = arith.constant 0 : index
    %c0_11 = arith.constant 0 : index
    %43 = vector.load %arg3[%c0_10, %c0_11] : memref<8x256xf32, #tpu.memory_space<vmem>>, vector<8x256xf32>
    tpu.vector_store %arg3[%c0_10, %c0_11], %42 {strides = array<i32>} : memref<8x256xf32, #tpu.memory_space<vmem>>, vector<8x256xf32>,
    return
  }
  func.func @transform_0(%arg0: i32, %arg1: i32) -> (i32, i32) {
    %c0_i32 = arith.constant 0 : i32
    return %arg0, %arg1 : i32, i32
  }
  func.func @transform_1(%arg0: i32, %arg1: i32) -> (i32, i32) {
    %c0_i32 = arith.constant 0 : i32
    return %arg0, %arg1 : i32, i32
  }
}

</mosaic_0001>

<bundles_post_ra>
// kernel: tpu_custom_call.1
= control target key start
LH: loop header
LB: loop body
LE: loop exit
PB: predicated region body
PF: predicated region fallthrough
CT: control target
= control target key end

     0   :  { %6 = vsyncpa [#allocation3], 0  ;;  %s711_s0 = inlined_call_operand.hbm [shape: f32[16,256], index: 0, kind: input, shape index: {}]   ;;  %s712_s1 = inlined_call_operand.hbm [shape: f32[16,256], index: 1, kind: output, shape index: {}]  }
   0x1   :  { %8 = vsyncpa [#allocation3 + $0x1], 0 }
   0x2   :  { %9 = vsyncpa [#allocation4], 0 }
   0x3   :  { %11 = vsyncpa [#allocation4 + $0x1], 0  ;;  %s535_s6 = smov 0   ;;  %s537_s7 = smov 0  }
   0x4   :  { %s539_s8 = smov 0   ;;  %s541_s9 = smov 0  }
   0x5   :  { %s543_s10 = smov 0   ;;  %s545_s11 = smov 0  }
   0x6 LB: > { %s322_s12 = sadd.s32 4294967295, %s521_s11   ;;  %s323_s13 = sadd.s32 4294967294, %s521_s11   ;;  %s521_s11 = sphi %s545_s11, %s17_s11   ;;  %s517_s10 = sphi %s543_s10, %s728_s10   ;;  %s513_s9 = sphi %s541_s9, %s727_s9   ;;  %s509_s8 = sphi %s539_s8, %s726_s8   ;;  %s505_s7 = sphi %s537_s7, %s725_s7   ;;  %s501_s6 = sphi %s535_s6, %s724_s6  }
   0x7   : > { %s29_s14 = sadd.s32 1, %s517_s10  ;;  %s38_s15 = sadd.s32 1, %s509_s8 }
   0x8   : > { %p31_p0 = scmp.ge.s32.totalorder %s29_s14, 2  ;;  %p45_p1 = scmp.ne.s32.totalorder %s509_s8, %s505_s7 }
   0x9   : > { %p46_p2 = scmp.eq.s32.totalorder %s521_s11, 0  ;;  %p51_p3 = scmp.ne.s32.totalorder %s505_s7, %s501_s6 }
   0xa   : > { %s730_s14 = smov (%p31_p0, %s29_s14), 0  ;;  %p52_p5 = scmp.eq.s32.totalorder %s322_s12, 0 }
   0xb   : > { %p576_p4 = por %p46_p2, %p45_p1  ;;  %s33_s17 = ssub.s32 %s517_s10, %s730_s14 }
   0xc   : > { %p77_p6 = scmp.eq.s32.totalorder %s322_s12, 1  ;;  %p36_p7 = scmp.eq.s32.totalorder %s33_s17, 0 }
   0xd   : > { %p582_p8 = por %p52_p5, %p51_p3  ;;  %p83_p10 = scmp.eq.s32.totalorder %s323_s13, 1 }
   0xe   : > { %p586_p9 = por %p77_p6, %p45_p1  ;;  %p351_p13 = scmp.lt.s32.totalorder %s521_s11, 2 }
   0xf   : > { %s591_s20 = scalar_select %p36_p7, %s509_s8, %s38_s15  }
  0x10   : > { %s716_s19 = scalar_select %p586_p9, 1, 0 }
  0x11   : > { %p593_p11 = por %p83_p10, %p51_p3  ;;  %s103_s22 = sand.u32 1, %s509_s8  }
  0x12   : > { %s326_s23 = sshll.u32 %s103_s22, 4  ;;  %s337_s24 = sshll.u32 %s517_s10, 8 }
  0x13   : > { %s717_s21 = scalar_select %p593_p11, 1, 0 }
  0x14   : > { %s604_s27 = scalar_lea.hbm %s711_s0, %s337_s24  ;;  %s107_s28 = scalar_lea.vmem [#allocation2], %s326_s23 }
  0x15   : > { %s117_s29 = sshll.u32 %s107_s28, 4  ;;  %p610_p0 = pnand %p351_p13, %p576_p4  ;;  %s606_s29 = int_to_ptr.vmem [resolvable:$true] %s117_s29 }
  0x16   : > { %s104_s2 = scalar_lea.sflag [#allocation3], %s103_s22  ;;  %s409_s3 = scalar_lea.hbm %s604_s27, 256 }
  0x17   : > { %p410_p3 = scmp.ne.s32.totalorder %s604_s27, %s409_s3  ;;  %p411_p5 = pneg %p610_p0 }
  0x18   : > { %s414_s12 = scalar_lea.hbm %s711_s0, 512  ;;  %p415_p4 = scmp.lt.u32.totalorder %s604_s27, %s711_s0 }
  0x19   : > { %p412_p6 = pnand %p411_p5, %p410_p3  ;;  %p416_p10 = scmp.lt.u32.totalorder %s414_s12, %s409_s3 }
  0x1a   : > { %p418_p12 = scmp.lt.u32.totalorder %s409_s3, %s604_s27 }
  0x1b   : > { %p413_p7 = pneg %p412_p6  ;;  %p417_p13 = por %p416_p10, %p415_p4 }
  0x1d   : > { %p419_p1 = por %p418_p12, %p417_p13 }
  0x1f   : > { %p420_p2 = pnand %p419_p1, %p413_p7 }
  0x21   : > { %423 = shalt.err (!%p420_p2)
}
  0x22   : > { %s424_s16 = scalar_lea.vmem %s606_s29, 256  ;;  %s523_s17 = smov [#allocation2]  }
  0x23   : > { %p425_p3 = scmp.ne.s32.totalorder %s606_s29, %s424_s16  ;;  %s429_s22 = sshll.u32 %s523_s17, 4  ;;  %s430_s22 = int_to_ptr.vmem [resolvable:$false] %s429_s22 }
  0x24   : > { %s431_s23 = scalar_lea.vmem %s430_s22, 512  ;;  %p432_p9 = scmp.lt.s32.totalorder %s606_s29, %s430_s22 }
  0x25   : > { %p427_p6 = pnand %p425_p3, %p411_p5  ;;  %p433_p4 = scmp.lt.s32.totalorder %s431_s23, %s424_s16 }
  0x27   : > { %p428_p11 = pneg %p427_p6  ;;  %p434_p10 = por %p433_p4, %p432_p9 }
  0x29   : > { %p435_p12 = pnand %p434_p10, %p428_p11 }
  0x2b   : > { %438 = shalt.err (!%p435_p12)
}
  0x2c   : > { %346 = dma.hbm_to_vmem [thread:$0]  (!%p610_p0), %s604_s27, 256, %s606_s29, %s104_s2  }
  0x2d   : > { %p719_p1 = scmp.lt.s32.totalorder %s521_s11, 3  ;;  %p720_p2 = scmp.ge.s32.totalorder %s521_s11, 1 }
  0x2f   : > { %p123_p5 = pnand %p720_p2, %p719_p1 }
  0x30   : > { %s646_s24 = sand.u32 (!%p123_p5), 1, %s505_s7  }
  0x31   : > { %126 = sbr.rel (%p123_p5) target bundleno = 120 (0x78), region = 24  ;;  %s330_s25 = sshll.u32 (!%p123_p5), %s646_s24, 4 }
  0x32   : > { %s129_s26 = scalar_lea.sflag (!%p123_p5), [#allocation3], %s646_s24  ;;  %s132_s28 = scalar_lea.vmem (!%p123_p5), [#allocation2], %s330_s25 }
  0x38   : > { %492 = dma.done.wait (%p582_p8), %s129_s26, 256  }
  0x39   : > { %494 = vsyncadd (%p582_p8), %s129_s26, 4294967040  ;;  %v157_v0 = vlaneseq  ;;  %v153_v2 = vld [vmem:[%s132_s28] sm:$0xff]  ;;  %v154_v3 = vld [vmem:[%s132_s28 + $0x8] sm:$0xff]  ;;  %s150_s18 = scalar_lea.vmem [#allocation5], %s330_s25  ;;  %s338_s29 = sshll.u32 %s513_s9, 8 }
  0x3a   : > { %v155_v4 = vmul.f32 %v153_v2, %v153_v2  ;;  %v156_v5 = vmul.f32 %v154_v3, %v154_v3  ;;  %s238_s27 = sshll.u32 %s150_s18, 4  ;;  %s664_s3 = scalar_lea.hbm %s712_s1, %s338_s29  ;;  %s659_s27 = int_to_ptr.vmem [resolvable:$true] %s238_s27 }
  0x3b   : > { %v158_v1 = vshrl.u32 %v157_v0, 7  ;;  %s222_s4 = scalar_lea.sflag [#allocation4], %s646_s24  ;;  %s439_s5 = scalar_lea.vmem %s659_s27, 256 }
  0x3c   : > { %v159_v6 = vrot.slane %v155_v4, 6  ;;  %v168_v7 = vrot.slane %v155_v4, 7  ;;  %v177_v8 = vrot.slane %v155_v4, 1  ;;  %v160_v9 = vrot.slane %v156_v5, 6  ;;  %p440_p8 = scmp.ne.s32.totalorder %s659_s27, %s439_s5  ;;  %p721_p9 = scmp.ne.s32.totalorder %s716_s19, 0 }
  0x3d   : > { %vm161_vm0 = vcmp.ge.s32.totalorder %v158_v1, 2  ;;  %vm170_vm1 = vcmp.ge.s32.totalorder %v158_v1, 1  ;;  %vm179_vm2 = vcmp.lt.s32.totalorder %v158_v1, 7  ;;  %v169_v10 = vrot.slane %v156_v5, 7  ;;  %s524_s9 = smov [#allocation5]  }
  0x3e   : > { %v178_v11 = vrot.slane %v156_v5, 1  ;;  %v164_v12 = vsel %vm161_vm0, %v159_v6, 0.0  ;;  %v173_v13 = vsel %vm170_vm1, %v168_v7, 0.0  ;;  %v186_v14 = vrot.slane %v155_v4, 2  ;;  %p441_p11 = pnand %p440_p8, %p721_p9  ;;  %s443_s12 = sshll.u32 %s524_s9, 4  ;;  %s444_s12 = int_to_ptr.vmem [resolvable:$false] %s443_s12 }
  0x3f   : > { %vm188_vm3 = vcmp.lt.s32.totalorder %v158_v1, 6  ;;  %v166_v15 = vadd.f32 %v164_v12, %v155_v4  ;;  %v165_v16 = vsel %vm161_vm0, %v160_v9, 0.0  ;;  %v174_v17 = vsel %vm170_vm1, %v169_v10, 0.0  ;;  %s445_s13 = scalar_lea.vmem %s444_s12, 512  ;;  %p446_p7 = scmp.lt.s32.totalorder %s659_s27, %s444_s12 }
  0x40   : > { %v187_v18 = vrot.slane %v156_v5, 2  ;;  %v182_v19 = vsel %vm179_vm2, %v177_v8, 0.0  ;;  %v167_v20 = vadd.f32 %v165_v16, %v156_v5  ;;  %v183_v22 = vsel %vm179_vm2, %v178_v11, 0.0  ;;  %p442_p0 = pneg %p441_p11  ;;  %p447_p13 = scmp.lt.s32.totalorder %s445_s13, %s439_s5 }
  0x41   : > { %v175_v21 = vadd.f32 %v173_v13, %v166_v15  ;;  %v191_v23 = vsel %vm188_vm3, %v186_v14, 0.0 }
  0x42   : > { %v176_v24 = vadd.f32 %v174_v17, %v167_v20  ;;  %v192_v26 = vsel %vm188_vm3, %v187_v18, 0.0  ;;  %p448_p3 = por %p447_p13, %p446_p7 }
  0x43   : > { %v184_v25 = vadd.f32 %v182_v19, %v175_v21 }
  0x44   : > { %v185_v27 = vadd.f32 %v183_v22, %v176_v24  ;;  %p449_p6 = pnand %p448_p3, %p442_p0 }
  0x45   : > { %v193_v28 = vadd.f32 %v191_v23, %v184_v25 }
  0x46   : > { %v194_v29 = vadd.f32 %v192_v26, %v185_v27 }
  0x47   : > { %v195_v30 = vmul.f32 2e-05, %v193_v28 }
  0x48   : > { %v196_v31 = vmul.f32 2e-05, %v194_v29 }
  0x49   : > { %v197_v32 = vadd.f32 1.0, %v195_v30 }
  0x4a   : > { %v198_v33 = vadd.f32 1.0, %v196_v31 }
  0x4b   : > { %401 = vrsqrt.f32 %v197_v32  ;;  %vm201_vm4 = vcmp.eq.f32.partialorder %v197_v32, inf  ;;  %v204_v35 = vand.u32 2147483648, %v197_v32  ;;  %vm203_vm5 = vcmp.eq.f32.partialorder %v197_v32, 0.0 }
  0x4c   : > { %403 = vrsqrt.f32 %v198_v33  ;;  %vm208_vm6 = vcmp.eq.f32.partialorder %v198_v33, inf  ;;  %v211_v38 = vand.u32 2147483648, %v198_v33  ;;  %vm210_vm7 = vcmp.eq.f32.partialorder %v198_v33, 0.0 }
  0x55   : > { %v402_v34 = vpop.eup %401 }
  0x56   : > { %v404_v36 = vpop.eup %403  ;;  %v200_v37 = vmul.f32 %v402_v34, %v197_v32 }
  0x57   : > { %v207_v39 = vmul.f32 %v404_v36, %v198_v33 }
  0x58   : > { %v202_v40 = vsel %vm201_vm4, %v197_v32, %v200_v37 }
  0x59   : > { %v205_v41 = vsel %vm203_vm5, %v204_v35, %v202_v40  ;;  %v209_v42 = vsel %vm208_vm6, %v198_v33, %v207_v39 }
  0x5a   : > { %v213_v43 = vmul.f32 %v205_v41, %v197_v32  ;;  %v212_v44 = vsel %vm210_vm7, %v211_v38, %v209_v42 }
  0x5b   : > { %v214_v45 = vmul.f32 %v212_v44, %v198_v33 }
  0x5c   : > { %405 = vrsqrt.f32 %v213_v43 }
  0x5d   : > { %407 = vrsqrt.f32 %v214_v45 }
  0x66   : > { %v406_v46 = vpop.eup %405 }
  0x67   : > { %v408_v47 = vpop.eup %407  ;;  %v217_v48 = vmul.f32 %v406_v46, %v153_v2 }
  0x68   : > { %v218_v49 = vmul.f32 %v408_v47, %v154_v3 }
  0x69   : > { %219 = vst [vmem:[%s150_s18] sm:$0xff] %v217_v48 }
  0x6a   : > { %220 = vst [vmem:[%s150_s18 + $0x8] sm:$0xff] %v218_v49 }
  0x6b   : > { %452 = shalt.err (!%p449_p6)
}
  0x6c   : > { %s453_s15 = scalar_lea.hbm %s664_s3, 256  ;;  %s457_s22 = scalar_lea.hbm %s712_s1, 512 }
  0x6d   : > { %p454_p4 = scmp.ne.s32.totalorder %s664_s3, %s453_s15  ;;  %p458_p1 = scmp.lt.u32.totalorder %s664_s3, %s712_s1 }
  0x6e   : > { %p459_p2 = scmp.lt.u32.totalorder %s457_s22, %s453_s15  ;;  %p461_p8 = scmp.lt.u32.totalorder %s453_s15, %s664_s3 }
  0x6f   : > { %p455_p10 = pnand %p454_p4, %p721_p9 }
  0x70   : > { %p460_p5 = por %p459_p2, %p458_p1 }
  0x71   : > { %p456_p12 = pneg %p455_p10 }
  0x72   : > { %p462_p11 = por %p461_p8, %p460_p5 }
  0x74   : > { %p463_p0 = pnand %p462_p11, %p456_p12 }
  0x76   : > { %466 = shalt.err (!%p463_p0)
}
  0x77   : > { %341 = dma.vmem_to_hbm [thread:$0]  (%p721_p9), %s659_s27, 256, %s664_s3, %s222_s4  }
  0x78 PF: > { %s250_s25 = sand.u32 1, %s501_s6   ;;  %p722_p7 = scmp.ne.s32.totalorder %s717_s21, 0 }
  0x79   : > { %p723_p13 = scmp.ge.s32.totalorder %s521_s11, 2  ;;  %s251_s26 = scalar_lea.sflag [#allocation4], %s250_s25 }
  0x7b   : > { %p348_p3 = pnand %p723_p13, %p722_p7 }
  0x7d   : > { %496 = dma.done.wait (!%p348_p3), %s251_s26, 256  }
  0x7e   : > { %498 = vsyncadd (!%p348_p3), %s251_s26, 4294967040  ;;  %s17_s11 = sadd.s32 1, %s521_s11   ;;  %s724_s6 = smov %s505_s7 }
  0x7f   : > { %p14_p6 = scmp.ge.s32.totalorder %s17_s11, 4   ;;  %s725_s7 = smov %s509_s8 }
  0x80   : > { %s726_s8 = smov %s591_s20  ;;  %s727_s9 = smov %s517_s10 }
  0x81   : > { %s728_s10 = smov %s730_s14  ;;  %16 = sbr.rel (!%p14_p6) target bundleno = 6 (0x6), region = 69 }
  0x88   :  { %256 = vsyncpa [#allocation3], 1 }
  0x89   :  { %258 = vsyncpa [#allocation3 + $0x1], 1 }
  0x8a   :  { %259 = vsyncpa [#allocation4], 1 }
  0x8b   :  { %261 = vsyncpa [#allocation4 + $0x1], 1 }

</bundles_post_ra>
